<compile_context>
chip_gen: v5e
topology: v5e:2x2
jax: 0.10.0
libtpu: 0.0.40
codegen_flags: <defaults>
</compile_context>

<pallas_src>
import jax
import jax.numpy as jnp
from jax.experimental import pallas as pl
from jax.experimental.pallas import tpu as pltpu

_EPS = 1e-07
_LANES = 128
_SUBLANES = 8
_MAX_ROW_TILE = 1024  # (1024, 128) f32 = 512 KiB per input per pipeline buffer


def _make_kernel(row_tile, lanes, steps_per_core):
    tile_elems = row_tile * lanes

    def kernel(n_ref, x_ref, t_ref, acc_ref):
        # acc_ref: (4, 8, lanes) f32, resident across the reduction axis.
        c = pl.program_id(0)
        i = pl.program_id(1)

        @pl.when(i == 0)
        def _():
            acc_ref[...] = jnp.zeros_like(acc_ref)

        x = x_ref[...].astype(jnp.float32)
        t = t_ref[...].astype(jnp.float32)

        # Shared transcendental work (1 exp + 1 div + 1 log1p per element):
        #   sigmoid(x) = where(x>=0, 1/(1+e), e/(1+e)),  e = exp(-|x|)
        #   bce(x, t)  = max(x, 0) - x*t + log1p(e)       (BCEWithLogitsLoss)
        e = jnp.exp(-jnp.abs(x))
        r = 1.0 / (1.0 + e)  # exact divide (approx reciprocal would hurt tolerance)
        p = jnp.where(x >= 0, r, e * r)
        bce = jnp.maximum(x, 0.0) - x * t + jnp.log1p(e)

        # Mask tail / out-of-bounds / duplicated (clamped) data by logical
        # element index.  NOTE: int32 index math => supports < 2**31 elements.
        blk = c * steps_per_core + i  # logical (unclamped) block index
        base = blk * tile_elems
        rid = jax.lax.broadcasted_iota(jnp.int32, (row_tile, lanes), 0)
        cid = jax.lax.broadcasted_iota(jnp.int32, (row_tile, lanes), 1)
        mask = (base + rid * lanes + cid) < n_ref[0]

        def part(v):
            # (row_tile, lanes) -> (8, lanes): vreg-aligned VPU adds only,
            # no cross-lane reduction inside the hot loop.
            return jnp.where(mask, v, 0.0).reshape(-1, _SUBLANES, lanes).sum(axis=0)

        acc_ref[0] += part(t * p)  # intersection = sum(target * sigmoid)
        acc_ref[1] += part(t)      # sum(target)
        acc_ref[2] += part(p)      # sum(sigmoid)
        acc_ref[3] += part(bce)    # sum of elementwise BCE-with-logits

    return kernel


def bce_jaccard_loss(logit, target, eps=_EPS):
    """Equivalent of BCEJaccardLoss().forward(logit, target) -> scalar."""
    n_elem = logit.size

    x = logit.reshape(-1)   # keep native dtype; cast to f32 inside the kernel
    t = target.reshape(-1)

    # Only pad (copy) when the flat length is not a multiple of 8*128 = 1024;
    # typical NCHW segmentation shapes divide evenly so this is usually free.
    chunk = _SUBLANES * _LANES
    padded = ((n_elem + chunk - 1) // chunk) * chunk
    if padded != n_elem:
        x = jnp.pad(x, (0, padded - n_elem))  # pad values are masked in-kernel
        t = jnp.pad(t, (0, padded - n_elem))

    rows = padded // _LANES                    # multiple of 8
    row_tile = min(_MAX_ROW_TILE, rows)        # multiple of 8, <= rows
    nblocks = pl.cdiv(rows, row_tile)
    ncores = 2 if nblocks >= 2 else 1          # megacore split (v7x); harmless elsewhere
    spc = pl.cdiv(nblocks, ncores)             # reduction steps per core

    x2d = x.reshape(rows, _LANES)
    t2d = t.reshape(rows, _LANES)
    n_arr = jnp.array([n_elem], dtype=jnp.int32)

    def in_map(c, i, n):
        # Clamp so over-allocated (core, step) pairs re-read a valid block;
        # their contribution is zeroed by the logical-index mask in the kernel.
        return (jnp.minimum(c * spc + i, nblocks - 1), 0)

    partials = pl.pallas_call(
        _make_kernel(row_tile, _LANES, spc),
        out_shape=jax.ShapeDtypeStruct((ncores, 4, _SUBLANES, _LANES), jnp.float32),
        grid_spec=pltpu.PrefetchScalarGridSpec(
            num_scalar_prefetch=1,
            grid=(ncores, spc),
            in_specs=[
                pl.BlockSpec((row_tile, _LANES), in_map),
                pl.BlockSpec((row_tile, _LANES), in_map),
            ],
            out_specs=pl.BlockSpec(
                (None, 4, _SUBLANES, _LANES), lambda c, i, n: (c, 0, 0, 0)
            ),
        ),
        compiler_params=pltpu.CompilerParams(
            dimension_semantics=("parallel", "arbitrary")
        ),
    )(n_arr, x2d, t2d)

    # Single cheap cross-lane/core reduction outside the kernel.
    sums = jnp.sum(partials, axis=(0, 2, 3))   # (4,)
    intersection, sum_t, sum_p, bce_sum = sums[0], sums[1], sums[2], sums[3]

    union = sum_t + sum_p - intersection + eps
    jaccard = 1.0 - (intersection + eps) / union
    bce = bce_sum / jnp.float32(n_elem)
    return jaccard + bce


def _reference(logit, target, eps=_EPS):
    x = logit.astype(jnp.float32)
    t = target.astype(jnp.float32)
    p = jax.nn.sigmoid(x)
    inter = jnp.sum(t * p)
    union = jnp.sum(t) + jnp.sum(p) - inter + eps
    jaccard = 1.0 - (inter + eps) / union
    bce = jnp.mean(jnp.maximum(x, 0.0) - x * t + jnp.log1p(jnp.exp(-jnp.abs(x))))
    return jaccard + bce


if __name__ == "__main__":
    key = jax.random.PRNGKey(0)
    k1, k2, k3, k4 = jax.random.split(key, 4)

    # Test 1: small NCHW shape (batch=2, channels=4, spatial=16x16).
    logit = jax.random.normal(k1, (2, 4, 16, 16), dtype=jnp.float32)
    target = (jax.random.uniform(k2, (2, 4, 16, 16)) > 0.5).astype(jnp.float32)
    out = jax.block_until_ready(bce_jaccard_loss(logit, target))
    ref = _reference(logit, target)
    assert jnp.allclose(out, ref, rtol=1e-5, atol=1e-5), (out, ref)

    # Test 2: larger, non-1024-divisible shape -> exercises tail masking,
    # partial last block and the two-core grid split / block-index clamp.
    logit2 = jax.random.normal(k3, (2, 3, 250, 250), dtype=jnp.float32)
    target2 = (jax.random.uniform(k4, (2, 3, 250, 250)) > 0.5).astype(jnp.float32)
    out2 = jax.block_until_ready(bce_jaccard_loss(logit2, target2))
    ref2 = _reference(logit2, target2)
    assert jnp.allclose(out2, ref2, rtol=3e-4, atol=3e-4), (out2, ref2)

    print("KERNEL_OK")
</pallas_src>

<mosaic_0001>
module attributes {stable_mosaic.version = 11 : i64} {
  func.func @kernel(%arg0: i32, %arg1: i32, %arg2: memref<1xi32, #tpu.memory_space<smem>>, %arg3: memref<16x128xf32, #tpu.memory_space<vmem>>, %arg4: memref<16x128xf32, #tpu.memory_space<vmem>>, %arg5: memref<1x4x8x128xf32, #tpu.memory_space<vmem>>) attributes {dimension_semantics = [#tpu.dimension_semantics<parallel>, #tpu.dimension_semantics<arbitrary>], iteration_bounds = array<i64: 1, 1>, scalar_prefetch = 1 : i64, scratch_operands = 0 : i64, tpu.core_type = #tpu.core_type<tc>, window_params = [{transform_indices = @transform_0, window_bounds = array<i64: 16, 128>}, {transform_indices = @transform_1, window_bounds = array<i64: 16, 128>}, {transform_indices = @transform_2, window_bounds = array<i64: 1, 4, 8, 128>}]} {
    %c0_i32 = arith.constant 0 : i32
    %0 = arith.cmpi eq, %arg1, %c0_i32 : i32
    %1 = arith.extui %0 : i1 to i32
    %c0_i32_0 = arith.constant 0 : i32
    %2 = arith.cmpi ne, %1, %c0_i32_0 : i32
    scf.if %2 {
      %cst_46 = arith.constant 0.000000e+00 : f32
      %77 = vector.broadcast %cst_46 : f32 to vector<4x8x128xf32>
      %c0_47 = arith.constant 0 : index
      %c0_48 = arith.constant 0 : index
      %c0_49 = arith.constant 0 : index
      %c0_50 = arith.constant 0 : index
      %78 = vector.load %arg5[%c0_47, %c0_48, %c0_49, %c0_50] : memref<1x4x8x128xf32, #tpu.memory_space<vmem>>, vector<1x4x8x128xf32>
      %79 = vector.shape_cast %78 : vector<1x4x8x128xf32> to vector<4x8x128xf32>
      %80 = vector.shape_cast %77 : vector<4x8x128xf32> to vector<1x4x8x128xf32>
      tpu.vector_store %arg5[%c0_47, %c0_48, %c0_49, %c0_50], %80 {strides = array<i32>} : memref<1x4x8x128xf32, #tpu.memory_space<vmem>>, vector<1x4x8x128xf32>,
    } else {
    }
    %c0 = arith.constant 0 : index
    %c0_1 = arith.constant 0 : index
    %3 = vector.load %arg3[%c0, %c0_1] : memref<16x128xf32, #tpu.memory_space<vmem>>, vector<16x128xf32>
    %c0_2 = arith.constant 0 : index
    %c0_3 = arith.constant 0 : index
    %4 = vector.load %arg4[%c0_2, %c0_3] : memref<16x128xf32, #tpu.memory_space<vmem>>, vector<16x128xf32>
    %5 = math.absf %3 : vector<16x128xf32>
    %cst = arith.constant 0.000000e+00 : f32
    %6 = vector.broadcast %cst : f32 to vector<16x128xf32>
    %7 = arith.subf %6, %5 : vector<16x128xf32>
    %8 = math.exp %7 : vector<16x128xf32>
    %cst_4 = arith.constant 1.000000e+00 : f32
    %9 = vector.broadcast %cst_4 : f32 to vector<16x128xf32>
    %10 = arith.addf %9, %8 : vector<16x128xf32>
    %cst_5 = arith.constant 1.000000e+00 : f32
    %11 = vector.broadcast %cst_5 : f32 to vector<16x128xf32>
    %12 = arith.divf %11, %10 : vector<16x128xf32>
    %cst_6 = arith.constant 0.000000e+00 : f32
    %13 = vector.broadcast %cst_6 : f32 to vector<16x128xf32>
    %14 = arith.cmpf oge, %3, %13 : vector<16x128xf32>
    %15 = arith.mulf %8, %12 : vector<16x128xf32>
    %16 = arith.select %14, %12, %15 : vector<16x128xi1>, vector<16x128xf32>
    %cst_7 = arith.constant 0.000000e+00 : f32
    %17 = vector.broadcast %cst_7 : f32 to vector<16x128xf32>
    %18 = arith.maximumf %3, %17 : vector<16x128xf32>
    %19 = arith.mulf %3, %4 : vector<16x128xf32>
    %20 = arith.subf %18, %19 : vector<16x128xf32>
    %21 = math.log1p %8 : vector<16x128xf32>
    %22 = arith.addf %20, %21 : vector<16x128xf32>
    %c1_i32 = arith.constant 1 : i32
    %23 = arith.muli %arg0, %c1_i32 : i32
    %24 = arith.addi %23, %arg1 : i32
    %c2048_i32 = arith.constant 2048 : i32
    %25 = arith.muli %24, %c2048_i32 : i32
    %26 = tpu.iota {dimensions = array<i32: 0>} : vector<16x128xi32>
    %27 = tpu.iota {dimensions = array<i32: 1>} : vector<16x128xi32>
    %c128_i32 = arith.constant 128 : i32
    %28 = vector.broadcast %c128_i32 : i32 to vector<16x128xi32>
    %29 = arith.muli %26, %28 : vector<16x128xi32>
    %30 = vector.broadcast %25 : i32 to vector<16x128xi32>
    %31 = arith.addi %30, %29 : vector<16x128xi32>
    %32 = arith.addi %31, %27 : vector<16x128xi32>
    %c0_8 = arith.constant 0 : index
    %33 = memref.load %arg2[%c0_8] : memref<1xi32, #tpu.memory_space<smem>>
    %34 = vector.broadcast %33 : i32 to vector<16x128xi32>
    %35 = arith.cmpi slt, %32, %34 : vector<16x128xi32>
    %c0_9 = arith.constant 0 : index
    %c0_10 = arith.constant 0 : index
    %c0_11 = arith.constant 0 : index
    %c0_12 = arith.constant 0 : index
    %36 = vector.load %arg5[%c0_9, %c0_10, %c0_11, %c0_12] : memref<1x4x8x128xf32, #tpu.memory_space<vmem>>, vector<1x1x8x128xf32>
    %37 = vector.shape_cast %36 : vector<1x1x8x128xf32> to vector<8x128xf32>
    %38 = arith.mulf %4, %16 : vector<16x128xf32>
    %cst_13 = arith.constant 0.000000e+00 : f32
    %39 = vector.broadcast %cst_13 : f32 to vector<16x128xf32>
    %40 = arith.select %35, %38, %39 : vector<16x128xi1>, vector<16x128xf32>
    %41 = vector.shape_cast %40 : vector<16x128xf32> to vector<2x8x128xf32>
    %cst_14 = arith.constant dense<0.000000e+00> : vector<8x128xf32>
    %42 = vector.multi_reduction <add>, %41, %cst_14 [0] : vector<2x8x128xf32> to vector<8x128xf32>
    %43 = arith.addf %37, %42 : vector<8x128xf32>
    %c0_15 = arith.constant 0 : index
    %c0_16 = arith.constant 0 : index
    %c0_17 = arith.constant 0 : index
    %c0_18 = arith.constant 0 : index
    %44 = vector.load %arg5[%c0_15, %c0_16, %c0_17, %c0_18] : memref<1x4x8x128xf32, #tpu.memory_space<vmem>>, vector<1x1x8x128xf32>
    %45 = vector.shape_cast %44 : vector<1x1x8x128xf32> to vector<8x128xf32>
    %46 = vector.shape_cast %43 : vector<8x128xf32> to vector<1x1x8x128xf32>
    tpu.vector_store %arg5[%c0_15, %c0_16, %c0_17, %c0_18], %46 {strides = array<i32>} : memref<1x4x8x128xf32, #tpu.memory_space<vmem>>, vector<1x1x8x128xf32>,
    %c0_19 = arith.constant 0 : index
    %c1 = arith.constant 1 : index
    %c0_20 = arith.constant 0 : index
    %c0_21 = arith.constant 0 : index
    %47 = vector.load %arg5[%c0_19, %c1, %c0_20, %c0_21] : memref<1x4x8x128xf32, #tpu.memory_space<vmem>>, vector<1x1x8x128xf32>
    %48 = vector.shape_cast %47 : vector<1x1x8x128xf32> to vector<8x128xf32>
    %cst_22 = arith.constant 0.000000e+00 : f32
    %49 = vector.broadcast %cst_22 : f32 to vector<16x128xf32>
    %50 = arith.select %35, %4, %49 : vector<16x128xi1>, vector<16x128xf32>
    %51 = vector.shape_cast %50 : vector<16x128xf32> to vector<2x8x128xf32>
    %cst_23 = arith.constant dense<0.000000e+00> : vector<8x128xf32>
    %52 = vector.multi_reduction <add>, %51, %cst_23 [0] : vector<2x8x128xf32> to vector<8x128xf32>
    %53 = arith.addf %48, %52 : vector<8x128xf32>
    %c0_24 = arith.constant 0 : index
    %c1_25 = arith.constant 1 : index
    %c0_26 = arith.constant 0 : index
    %c0_27 = arith.constant 0 : index
    %54 = vector.load %arg5[%c0_24, %c1_25, %c0_26, %c0_27] : memref<1x4x8x128xf32, #tpu.memory_space<vmem>>, vector<1x1x8x128xf32>
    %55 = vector.shape_cast %54 : vector<1x1x8x128xf32> to vector<8x128xf32>
    %56 = vector.shape_cast %53 : vector<8x128xf32> to vector<1x1x8x128xf32>
    tpu.vector_store %arg5[%c0_24, %c1_25, %c0_26, %c0_27], %56 {strides = array<i32>} : memref<1x4x8x128xf32, #tpu.memory_space<vmem>>, vector<1x1x8x128xf32>,
    %c0_28 = arith.constant 0 : index
    %c2 = arith.constant 2 : index
    %c0_29 = arith.constant 0 : index
    %c0_30 = arith.constant 0 : index
    %57 = vector.load %arg5[%c0_28, %c2, %c0_29, %c0_30] : memref<1x4x8x128xf32, #tpu.memory_space<vmem>>, vector<1x1x8x128xf32>
    %58 = vector.shape_cast %57 : vector<1x1x8x128xf32> to vector<8x128xf32>
    %cst_31 = arith.constant 0.000000e+00 : f32
    %59 = vector.broadcast %cst_31 : f32 to vector<16x128xf32>
    %60 = arith.select %35, %16, %59 : vector<16x128xi1>, vector<16x128xf32>
    %61 = vector.shape_cast %60 : vector<16x128xf32> to vector<2x8x128xf32>
    %cst_32 = arith.constant dense<0.000000e+00> : vector<8x128xf32>
    %62 = vector.multi_reduction <add>, %61, %cst_32 [0] : vector<2x8x128xf32> to vector<8x128xf32>
    %63 = arith.addf %58, %62 : vector<8x128xf32>
    %c0_33 = arith.constant 0 : index
    %c2_34 = arith.constant 2 : index
    %c0_35 = arith.constant 0 : index
    %c0_36 = arith.constant 0 : index
    %64 = vector.load %arg5[%c0_33, %c2_34, %c0_35, %c0_36] : memref<1x4x8x128xf32, #tpu.memory_space<vmem>>, vector<1x1x8x128xf32>
    %65 = vector.shape_cast %64 : vector<1x1x8x128xf32> to vector<8x128xf32>
    %66 = vector.shape_cast %63 : vector<8x128xf32> to vector<1x1x8x128xf32>
    tpu.vector_store %arg5[%c0_33, %c2_34, %c0_35, %c0_36], %66 {strides = array<i32>} : memref<1x4x8x128xf32, #tpu.memory_space<vmem>>, vector<1x1x8x128xf32>,
    %c0_37 = arith.constant 0 : index
    %c3 = arith.constant 3 : index
    %c0_38 = arith.constant 0 : index
    %c0_39 = arith.constant 0 : index
    %67 = vector.load %arg5[%c0_37, %c3, %c0_38, %c0_39] : memref<1x4x8x128xf32, #tpu.memory_space<vmem>>, vector<1x1x8x128xf32>
    %68 = vector.shape_cast %67 : vector<1x1x8x128xf32> to vector<8x128xf32>
    %cst_40 = arith.constant 0.000000e+00 : f32
    %69 = vector.broadcast %cst_40 : f32 to vector<16x128xf32>
    %70 = arith.select %35, %22, %69 : vector<16x128xi1>, vector<16x128xf32>
    %71 = vector.shape_cast %70 : vector<16x128xf32> to vector<2x8x128xf32>
    %cst_41 = arith.constant dense<0.000000e+00> : vector<8x128xf32>
    %72 = vector.multi_reduction <add>, %71, %cst_41 [0] : vector<2x8x128xf32> to vector<8x128xf32>
    %73 = arith.addf %68, %72 : vector<8x128xf32>
    %c0_42 = arith.constant 0 : index
    %c3_43 = arith.constant 3 : index
    %c0_44 = arith.constant 0 : index
    %c0_45 = arith.constant 0 : index
    %74 = vector.load %arg5[%c0_42, %c3_43, %c0_44, %c0_45] : memref<1x4x8x128xf32, #tpu.memory_space<vmem>>, vector<1x1x8x128xf32>
    %75 = vector.shape_cast %74 : vector<1x1x8x128xf32> to vector<8x128xf32>
    %76 = vector.shape_cast %73 : vector<8x128xf32> to vector<1x1x8x128xf32>
    tpu.vector_store %arg5[%c0_42, %c3_43, %c0_44, %c0_45], %76 {strides = array<i32>} : memref<1x4x8x128xf32, #tpu.memory_space<vmem>>, vector<1x1x8x128xf32>,
    return
  }
  func.func @transform_0(%arg0: i32, %arg1: i32, %arg2: memref<1xi32, #tpu.memory_space<smem>>) -> (i32, i32) {
    %c1_i32 = arith.constant 1 : i32
    %0 = arith.muli %arg0, %c1_i32 : i32
    %1 = arith.addi %0, %arg1 : i32
    %c0_i32 = arith.constant 0 : i32
    %2 = arith.minsi %1, %c0_i32 : i32
    %c0_i32_0 = arith.constant 0 : i32
    %c0_i32_1 = arith.constant 0 : i32
    return %2, %c0_i32_0 : i32, i32
  }
  func.func @transform_1(%arg0: i32, %arg1: i32, %arg2: memref<1xi32, #tpu.memory_space<smem>>) -> (i32, i32) {
    %c1_i32 = arith.constant 1 : i32
    %0 = arith.muli %arg0, %c1_i32 : i32
    %1 = arith.addi %0, %arg1 : i32
    %c0_i32 = arith.constant 0 : i32
    %2 = arith.minsi %1, %c0_i32 : i32
    %c0_i32_0 = arith.constant 0 : i32
    %c0_i32_1 = arith.constant 0 : i32
    return %2, %c0_i32_0 : i32, i32
  }
  func.func @transform_2(%arg0: i32, %arg1: i32, %arg2: memref<1xi32, #tpu.memory_space<smem>>) -> (i32, i32, i32, i32) {
    %c0_i32 = arith.constant 0 : i32
    %c0_i32_0 = arith.constant 0 : i32
    %c0_i32_1 = arith.constant 0 : i32
    %c0_i32_2 = arith.constant 0 : i32
    return %arg0, %c0_i32, %c0_i32_0, %c0_i32_1 : i32, i32, i32, i32
  }
}

</mosaic_0001>

<bundles_post_ra>
// kernel: tpu_custom_call.1
= control target key start
LH: loop header
LB: loop body
LE: loop exit
PB: predicated region body
PF: predicated region fallthrough
CT: control target
= control target key end

     0   :  { %9 = vsyncpa [#allocation5], 0  ;;  %s443_s0 = inlined_call_operand.<no memory space> [shape: s32[1], index: 0, kind: input, shape index: {}]   ;;  %s444_s1 = inlined_call_operand.hbm [shape: f32[16,128], index: 1, kind: input, shape index: {}]   ;;  %s445_s2 = inlined_call_operand.hbm [shape: f32[16,128], index: 2, kind: input, shape index: {}]   ;;  %s446_s3 = inlined_call_operand.hbm [shape: f32[1,4,8,128], index: 3, kind: output, shape index: {}]  }
   0x1   :  { %10 = vsyncpa [#allocation8], 0 }
   0x2   :  { %11 = vsyncpa [#allocation6], 0  ;;  %s22_s14 = sshll.u32 %s444_s1, 4  ;;  %s317_s15 = smov [#allocation4]   ;;  %s23_s14 = int_to_ptr.hbm [resolvable:$true] %s22_s14 }
   0x3   :  { %s24_s16 = sshll.u32 %s317_s15, 4  ;;  %s41_s19 = sshll.u32 %s445_s2, 4  ;;  %s25_s16 = int_to_ptr.vmem [resolvable:$true] %s24_s16  ;;  %s42_s19 = int_to_ptr.hbm [resolvable:$true] %s41_s19 }
   0x4   :  { %s318_s20 = smov 128   ;;  %s319_s21 = smov 8  }
   0x5   :  { %30 = dma.hbm_to_vmem [thread:$0]  %s23_s14, 256, %s25_s16, [#allocation5], %s318_s20, %s318_s20, %s319_s21  }
   0x6   :  { %s320_s22 = smov [#allocation7]  }
   0x7   :  { %s43_s23 = sshll.u32 %s320_s22, 4  ;;  %s44_s23 = int_to_ptr.vmem [resolvable:$true] %s43_s23 }
   0x8   :  { %49 = dma.hbm_to_vmem [thread:$0]  %s42_s19, 256, %s44_s23, [#allocation8], %s318_s20, %s318_s20, %s319_s21  }
   0x9   :  { %311 = dma.done.wait [#allocation5], 256  }
   0xa   :  { %312 = vsyncadd [#allocation5], 4294967040 }
   0xb   :  { %313 = dma.done.wait [#allocation8], 256  }
   0xc   :  { %314 = vsyncadd [#allocation8], 4294967040  ;;  %v152_v0 = vlaneseq  ;;  %v354_v2 = vld [vmem:[#allocation4] sm:$0xff]  ;;  %v356_v3 = vld [vmem:[#allocation4 + $0x8] sm:$0xff]  ;;  %v165_v14 = vstv %s443_s0  ;;  %s321_s0 = smov [#allocation9]   ;;  %s203_s27 = sshll.u32 %s446_s3, 4  ;;  %s204_s27 = int_to_ptr.hbm [resolvable:$true] %s203_s27 }
   0xd   :  { %v78_v5 = vand.u32 2147483647, %v354_v2  ;;  %v79_v6 = vand.u32 2147483647, %v356_v3  ;;  %v363_v17 = vld [vmem:[#allocation7] sm:$0xff]  ;;  %v365_v18 = vld [vmem:[#allocation7 + $0x8] sm:$0xff] }
   0xe   :  { %v153_v1 = vshrl.u32 %v152_v0, 7  ;;  %v156_v7 = vand.u32 127, %v152_v0  ;;  %v126_v30 = vmul.f32 %v363_v17, %v354_v2  ;;  %v124_v31 = vmax.f32 %v354_v2, 0.0  ;;  %s201_s24 = sshll.u32 %s321_s0, 4  ;;  %s202_s24 = int_to_ptr.vmem [resolvable:$true] %s201_s24 }
   0xf   :  { %v80_v10 = vsub.f32 0.0, %v78_v5  ;;  %v81_v11 = vsub.f32 0.0, %v79_v6  ;;  %v125_v32 = vmax.f32 %v356_v3, 0.0  ;;  %v127_v33 = vmul.f32 %v365_v18, %v356_v3 }
  0x10   :  { %v154_v4 = vadd.s32 8, %v153_v1  ;;  %v157_v8 = vmul.u32 128, %v153_v1  ;;  %v128_v40 = vsub.f32 %v124_v31, %v126_v30  ;;  %vm118_vm12 = vcmp.ge.f32.partialorder %v354_v2, 0.0 }
  0x11   :  { %v82_v15 = vmul.f32 1.442695, %v80_v10  ;;  %v84_v16 = vmul.f32 1.442695, %v81_v11  ;;  %v129_v41 = vsub.f32 %v125_v32, %v127_v33  ;;  %vm119_vm13 = vcmp.ge.f32.partialorder %v356_v3, 0.0 }
  0x12   :  { %v158_v9 = vmul.u32 128, %v154_v4  ;;  %v162_v12 = vadd.s32 %v157_v8, %v156_v7 }
  0x13   :  { %227 = vpow2.f32 %v82_v15 }
  0x14   :  { %v163_v13 = vadd.s32 %v158_v9, %v156_v7  ;;  %vm367_vm0 = vcmp.lt.s32.totalorder %v162_v12, %v165_v14  ;;  %229 = vpow2.f32 %v84_v16 }
  0x15   :  { %v178_v21 = vsel %vm367_vm0, %v363_v17, 0.0 }
  0x16   :  { %vm371_vm1 = vcmp.lt.s32.totalorder %v163_v13, %v165_v14 }
  0x17   :  { %v179_v22 = vsel %vm371_vm1, %v365_v18, 0.0 }
  0x18   :  { %v180_v23 = vadd.f32 %v179_v22, %v178_v21 }
  0x19   :  { %v381_v24 = vpop.eup %227 }
  0x1a   :  { %182 = vst [vmem:[#allocation9 + $0x8] sm:$0xff] %v180_v23  ;;  %v383_v25 = vpop.eup %229  ;;  %v86_v26 = vadd.f32 1.0, %v381_v24  ;;  %v133_v28 = vmul.f32 -0.5, %v381_v24  ;;  %v136_v35 = vand.u32 2147483647, %v381_v24 }
  0x1b   :  { %v87_v27 = vadd.f32 1.0, %v383_v25  ;;  %v142_v29 = vmul.f32 -0.5, %v383_v25  ;;  %v145_v37 = vand.u32 2147483647, %v383_v25 }
  0x1c   :  { %231 = vrcp.f32 %v86_v26  ;;  %v134_v34 = vadd.f32 1.0, %v133_v28  ;;  %vm93_vm2 = vweird.f32 %v86_v26  ;;  %v97_v39 = vand.u32 2147483647, %v86_v26 }
  0x1d   :  { %233 = vrcp.f32 %v87_v27  ;;  %v143_v36 = vadd.f32 1.0, %v142_v29  ;;  %v99_v44 = vand.u32 2147483648, %v86_v26  ;;  %vm108_vm3 = vweird.f32 %v87_v27 }
  0x1e   :  { %235 = vlog2.f32 %v86_v26  ;;  %v135_v45 = vmul.f32 %v381_v24, %v134_v34  ;;  %v114_v48 = vand.u32 2147483648, %v87_v27  ;;  %vm398_vm4 = vcmp.lt.f32.partialorder %v136_v35, 0.0004427343 }
  0x1f   :  { %237 = vlog2.f32 %v87_v27  ;;  %v144_v50 = vmul.f32 %v383_v25, %v143_v36  ;;  %vm403_vm6 = vcmp.lt.f32.partialorder %v145_v37, 0.0004427343  ;;  %v112_v56 = vand.u32 2147483647, %v87_v27 }
  0x20   :  { %v100_v61 = vor.u32 1.1754944e-38, %v99_v44  ;;  %vm98_vm9 = vcmp.eq.f32.partialorder %v97_v39, 8.507059e+37  ;;  %v115_v4 = vor.u32 1.1754944e-38, %v114_v48 }
  0x21   :  { %vm113_vm11 = vcmp.eq.f32.partialorder %v112_v56, 8.507059e+37 }
  0x22   :  { %v232_v38 = vpop.eup %231 }
  0x23   :  { %v234_v42 = vpop.eup %233  ;;  %v89_v43 = vmul.f32 %v232_v38, %v86_v26  ;;  %vm94_vm5 = vweird.f32 %v232_v38 }
  0x24   :  { %v236_v46 = vpop.eup %235  ;;  %v104_v47 = vmul.f32 %v234_v42, %v87_v27  ;;  %vm109_vm7 = vweird.f32 %v234_v42  ;;  %vm410_vm8 = vmor %vm93_vm2, %vm94_vm5 }
  0x25   :  { %v238_v51 = vpop.eup %237  ;;  %v90_v52 = vsub.f32 1.0, %v89_v43  ;;  %v132_v53 = vmul.f32 0.6931472, %v236_v46  ;;  %vm110_vm10 = vmor %vm108_vm3, %vm109_vm7 }
  0x26   :  { %v105_v55 = vsub.f32 1.0, %v104_v47  ;;  %v141_v57 = vmul.f32 0.6931472, %v238_v51 }
  0x27   :  { %v91_v58 = vmul.f32 %v232_v38, %v90_v52  ;;  %v138_v59 = vsel %vm398_vm4, %v135_v45, %v132_v53 }
  0x28   :  { %v106_v62 = vmul.f32 %v234_v42, %v105_v55  ;;  %v147_v63 = vsel %vm403_vm6, %v144_v50, %v141_v57  ;;  %v148_v0 = vadd.f32 %v138_v59, %v128_v40 }
  0x29   :  { %v92_v1 = vadd.f32 %v232_v38, %v91_v58  ;;  %v149_v5 = vadd.f32 %v147_v63, %v129_v41 }
  0x2a   :  { %v107_v6 = vadd.f32 %v234_v42, %v106_v62  ;;  %v192_v7 = vsel %vm367_vm0, %v148_v0, 0.0 }
  0x2b   :  { %v96_v8 = vsel %vm410_vm8, %v232_v38, %v92_v1  ;;  %v193_v9 = vsel %vm371_vm1, %v149_v5, 0.0 }
  0x2c   :  { %v101_v10 = vsel %vm98_vm9, %v100_v61, %v96_v8  ;;  %v111_v11 = vsel %vm110_vm10, %v234_v42, %v107_v6  ;;  %v194_v12 = vadd.f32 %v193_v9, %v192_v7 }
  0x2d   :  { %v116_v13 = vsel %vm113_vm11, %v115_v4, %v111_v11  ;;  %v120_v14 = vmul.f32 %v381_v24, %v101_v10 }
  0x2e   :  { %v121_v15 = vmul.f32 %v383_v25, %v116_v13  ;;  %196 = vst [vmem:[#allocation9 + $0x18] sm:$0xff] %v194_v12 }
  0x2f   :  { %v122_v16 = vsel %vm118_vm12, %v101_v10, %v120_v14 }
  0x30   :  { %v123_v21 = vsel %vm119_vm13, %v116_v13, %v121_v15  ;;  %v169_v22 = vmul.f32 %v122_v16, %v363_v17  ;;  %v185_v23 = vsel %vm367_vm0, %v122_v16, 0.0 }
  0x31   :  { %v170_v26 = vmul.f32 %v123_v21, %v365_v18  ;;  %v186_v2 = vsel %vm371_vm1, %v123_v21, 0.0 }
  0x32   :  { %v171_v3 = vsel %vm367_vm0, %v169_v22, 0.0  ;;  %v187_v27 = vadd.f32 %v186_v2, %v185_v23 }
  0x33   :  { %v172_v24 = vsel %vm371_vm1, %v170_v26, 0.0 }
  0x34   :  { %v173_v17 = vadd.f32 %v172_v24, %v171_v3  ;;  %189 = vst [vmem:[#allocation9 + $0x10] sm:$0xff] %v187_v27 }
  0x36   :  { %175 = vst [vmem:[#allocation9] sm:$0xff] %v173_v17 }
  0x37   :  { %209 = dma.vmem_to_hbm [thread:$0]  %s202_s24, 512, %s204_s27, [#allocation6], %s318_s20, %s318_s20, %s319_s21  }
  0x38   :  { %315 = dma.done.wait [#allocation6], 512  }
  0x39   :  { %316 = vsyncadd [#allocation6], 4294966784 }
  0x3a   :  { %214 = vsyncpa [#allocation5], 1 }
  0x3b   :  { %215 = vsyncpa [#allocation8], 1 }
  0x3c   :  { %216 = vsyncpa [#allocation6], 1 }

</bundles_post_ra>
